<compile_context>
chip_gen: v6e
topology: v6e:2x2x1
jax: 0.10.0
libtpu: 0.0.40
codegen_flags: <defaults>
</compile_context>

<pallas_src>
import functools

import jax
import jax.numpy as jnp
from jax.experimental import pallas as pl
from jax.experimental.pallas import tpu as pltpu

NUM_FEATS_TOT = 32      # module-level constant referenced by NN_OSSR.__init__
NUM_FEATS_HIDDEN = 64
NUM_CLASSES = 10


def _mlp_kernel(x_ref, w1_ref, b1_ref, w2_ref, b2_ref, o_ref):
    # x tile: [TB, F] bf16 (streamed); weights/biases: resident across all grid steps.
    x = x_ref[...]
    h = jnp.dot(x, w1_ref[...],
                preferred_element_type=jnp.float32)      # [TB, HP] f32 accumulate
    h = jnp.maximum(h + b1_ref[...], 0.0)                # bias + ReLU in f32
    h = h.astype(jnp.bfloat16)                           # bf16 LHS for second MXU pass
    o = jnp.dot(h, w2_ref[...],
                preferred_element_type=jnp.float32)      # [TB, C] f32 accumulate
    o_ref[...] = o + b2_ref[...]                         # broadcast [1, C]


def _round_up(n: int, m: int) -> int:
    return int(pl.cdiv(n, m) * m)


@functools.partial(jax.jit, static_argnames=("tile_batch",))
def nn_ossr_forward(x, w1, b1, w2, b2, *, tile_batch: int = 1024):
    """x: [B, 32] f32; w1: [32, 64]; b1: [64]; w2: [64, C]; b2: [C] -> logits [B, C] f32.

    Weights stored [in, out] (transposed vs. PyTorch's [out, in]) so this computes
    x @ W + b == PyTorch's x @ W.T + b.
    """
    B, F = x.shape
    H = w1.shape[1]
    C = w2.shape[1]

    # Pad hidden dim to a full 128-lane width (free on the MXU, keeps vregs dense).
    HP = max(128, _round_up(H, 128))
    if HP != H:
        w1 = jnp.pad(w1, ((0, 0), (0, HP - H)))
        b1 = jnp.pad(b1.reshape(-1), (0, HP - H))
        w2 = jnp.pad(w2, ((0, HP - H), (0, 0)))
    b1 = b1.reshape(1, HP).astype(jnp.float32)
    b2 = b2.reshape(1, C).astype(jnp.float32)

    # Batch tiling: TB rows per grid step (multiple of 8 sublanes); pad B so grid divides.
    TB = min(tile_batch, _round_up(B, 8))
    B_pad = _round_up(B, TB)
    if B_pad != B:
        x = jnp.pad(x, ((0, B_pad - B), (0, 0)))

    # bf16 inputs halve HBM traffic for x (the dominant stream); accumulation stays f32.
    x = x.astype(jnp.bfloat16)
    w1 = w1.astype(jnp.bfloat16)
    w2 = w2.astype(jnp.bfloat16)

    out = pl.pallas_call(
        _mlp_kernel,
        out_shape=jax.ShapeDtypeStruct((B_pad, C), jnp.float32),
        grid_spec=pltpu.PrefetchScalarGridSpec(
            num_scalar_prefetch=0,
            grid=(B_pad // TB,),
            in_specs=[
                pl.BlockSpec((TB, F), lambda i: (i, 0)),   # x: streamed over batch
                pl.BlockSpec((F, HP), lambda i: (0, 0)),   # w1: resident
                pl.BlockSpec((1, HP), lambda i: (0, 0)),   # b1: resident
                pl.BlockSpec((HP, C), lambda i: (0, 0)),   # w2: resident
                pl.BlockSpec((1, C), lambda i: (0, 0)),    # b2: resident
            ],
            out_specs=pl.BlockSpec((TB, C), lambda i: (i, 0)),
        ),
        compiler_params=pltpu.CompilerParams(
            # Batch axis is embarrassingly parallel: shards across v7x's 2 TCs,
            # harmless on single-TC v5e/v6e.
            dimension_semantics=("parallel",),
        ),
    )(x, w1, b1, w2, b2)
    return out[:B]


def init_params(key, in_feats, hidden, num_classes):
    """Deterministic init mirroring torch.nn.Linear (uniform +/- 1/sqrt(fan_in))."""
    k1, k2, k3, k4 = jax.random.split(key, 4)
    bound1 = 1.0 / jnp.sqrt(in_feats)
    bound2 = 1.0 / jnp.sqrt(hidden)
    # Stored as [in, out] so the kernel computes x @ W + b (== PyTorch x @ W.T + b).
    w1 = jax.random.uniform(k1, (in_feats, hidden), jnp.float32, -bound1, bound1)
    b1 = jax.random.uniform(k2, (hidden,), jnp.float32, -bound1, bound1)
    w2 = jax.random.uniform(k3, (hidden, num_classes), jnp.float32, -bound2, bound2)
    b2 = jax.random.uniform(k4, (num_classes,), jnp.float32, -bound2, bound2)
    return w1, b1, w2, b2


if __name__ == "__main__":
    key = jax.random.PRNGKey(0)
    kx, kp = jax.random.split(key)

    w1, b1, w2, b2 = init_params(kp, NUM_FEATS_TOT, NUM_FEATS_HIDDEN, NUM_CLASSES)

    def ref_forward(xv):
        # Plain-JAX reference with the same precision policy as the kernel
        # (bf16 inputs / hidden, f32 accumulation and elementwise math).
        xb = xv.astype(jnp.bfloat16).astype(jnp.float32)
        w1b = w1.astype(jnp.bfloat16).astype(jnp.float32)
        w2b = w2.astype(jnp.bfloat16).astype(jnp.float32)
        h = jnp.maximum(xb @ w1b + b1[None, :], 0.0)
        hb = h.astype(jnp.bfloat16).astype(jnp.float32)
        return hb @ w2b + b2[None, :]

    # Small batch (single grid step).
    batch = 8
    x = jax.random.normal(kx, (batch, NUM_FEATS_TOT), jnp.float32)
    logits = nn_ossr_forward(x, w1, b1, w2, b2)
    jax.block_until_ready(logits)
    assert logits.shape == (batch, NUM_CLASSES)
    assert jnp.allclose(logits, ref_forward(x), atol=1e-3, rtol=1e-3)

    # Larger, tile-non-divisible batch: exercises the grid, batch padding and final slice.
    batch2 = 2500
    x2 = jax.random.normal(kx, (batch2, NUM_FEATS_TOT), jnp.float32)
    logits2 = nn_ossr_forward(x2, w1, b1, w2, b2)
    jax.block_until_ready(logits2)
    assert logits2.shape == (batch2, NUM_CLASSES)
    assert jnp.allclose(logits2, ref_forward(x2), atol=1e-3, rtol=1e-3)

    print("KERNEL_OK")
</pallas_src>

<mosaic_0001>
module attributes {stable_mosaic.version = 11 : i64} {
  func.func @_mlp_kernel(%arg0: i32, %arg1: memref<8x32xbf16, #tpu.memory_space<vmem>>, %arg2: memref<32x128xbf16, #tpu.memory_space<vmem>>, %arg3: memref<1x128xf32, #tpu.memory_space<vmem>>, %arg4: memref<128x10xbf16, #tpu.memory_space<vmem>>, %arg5: memref<1x10xf32, #tpu.memory_space<vmem>>, %arg6: memref<8x10xf32, #tpu.memory_space<vmem>>) attributes {dimension_semantics = [#tpu.dimension_semantics<parallel>], iteration_bounds = array<i64: 1>, scalar_prefetch = 0 : i64, scratch_operands = 0 : i64, tpu.core_type = #tpu.core_type<tc>, window_params = [{transform_indices = @transform_0, window_bounds = array<i64: 8, 32>}, {pipeline_mode = #tpu.pipeline_mode<synchronous>, transform_indices = @transform_1, window_bounds = array<i64: 32, 128>}, {pipeline_mode = #tpu.pipeline_mode<synchronous>, transform_indices = @transform_2, window_bounds = array<i64: 1, 128>}, {pipeline_mode = #tpu.pipeline_mode<synchronous>, transform_indices = @transform_3, window_bounds = array<i64: 128, 10>}, {pipeline_mode = #tpu.pipeline_mode<synchronous>, transform_indices = @transform_4, window_bounds = array<i64: 1, 10>}, {transform_indices = @transform_5, window_bounds = array<i64: 8, 10>}]} {
    %c0 = arith.constant 0 : index
    %c0_0 = arith.constant 0 : index
    %0 = vector.load %arg1[%c0, %c0_0] : memref<8x32xbf16, #tpu.memory_space<vmem>>, vector<8x32xbf16>
    %c0_1 = arith.constant 0 : index
    %c0_2 = arith.constant 0 : index
    %1 = vector.load %arg2[%c0_1, %c0_2] : memref<32x128xbf16, #tpu.memory_space<vmem>>, vector<32x128xbf16>
    %cst = arith.constant dense<0.000000e+00> : vector<8x128xf32>
    %2 = tpu.matmul %0, %1, %cst {dimension_numbers = #tpu.dot_dimension_numbers<[1], [0], [0], [1], [0, 0, 1, 1], [], []>} : vector<8x32xbf16>, vector<32x128xbf16>, vector<8x128xf32> -> vector<8x128xf32>
    %c0_3 = arith.constant 0 : index
    %c0_4 = arith.constant 0 : index
    %3 = vector.load %arg3[%c0_3, %c0_4] : memref<1x128xf32, #tpu.memory_space<vmem>>, vector<1x128xf32>
    %4 = vector.broadcast %3 : vector<1x128xf32> to vector<8x128xf32>
    %5 = arith.addf %2, %4 : vector<8x128xf32>
    %cst_5 = arith.constant 0.000000e+00 : f32
    %6 = vector.broadcast %cst_5 : f32 to vector<8x128xf32>
    %7 = arith.maximumf %5, %6 : vector<8x128xf32>
    %8 = arith.truncf %7 : vector<8x128xf32> to vector<8x128xbf16>
    %c0_6 = arith.constant 0 : index
    %c0_7 = arith.constant 0 : index
    %9 = vector.load %arg4[%c0_6, %c0_7] : memref<128x10xbf16, #tpu.memory_space<vmem>>, vector<128x10xbf16>
    %cst_8 = arith.constant dense<0.000000e+00> : vector<8x10xf32>
    %10 = tpu.matmul %8, %9, %cst_8 {dimension_numbers = #tpu.dot_dimension_numbers<[1], [0], [0], [1], [0, 0, 1, 1], [], []>} : vector<8x128xbf16>, vector<128x10xbf16>, vector<8x10xf32> -> vector<8x10xf32>
    %c0_9 = arith.constant 0 : index
    %c0_10 = arith.constant 0 : index
    %11 = vector.load %arg5[%c0_9, %c0_10] : memref<1x10xf32, #tpu.memory_space<vmem>>, vector<1x10xf32>
    %12 = vector.broadcast %11 : vector<1x10xf32> to vector<8x10xf32>
    %13 = arith.addf %10, %12 : vector<8x10xf32>
    %c0_11 = arith.constant 0 : index
    %c0_12 = arith.constant 0 : index
    %14 = vector.load %arg6[%c0_11, %c0_12] : memref<8x10xf32, #tpu.memory_space<vmem>>, vector<8x10xf32>
    tpu.vector_store %arg6[%c0_11, %c0_12], %13 {strides = array<i32>} : memref<8x10xf32, #tpu.memory_space<vmem>>, vector<8x10xf32>,
    return
  }
  func.func @transform_0(%arg0: i32) -> (i32, i32) {
    %c0_i32 = arith.constant 0 : i32
    %c0_i32_0 = arith.constant 0 : i32
    return %arg0, %c0_i32 : i32, i32
  }
  func.func @transform_1(%arg0: i32) -> (i32, i32) {
    %c0_i32 = arith.constant 0 : i32
    %c0_i32_0 = arith.constant 0 : i32
    %c0_i32_1 = arith.constant 0 : i32
    return %c0_i32, %c0_i32_0 : i32, i32
  }
  func.func @transform_2(%arg0: i32) -> (i32, i32) {
    %c0_i32 = arith.constant 0 : i32
    %c0_i32_0 = arith.constant 0 : i32
    %c0_i32_1 = arith.constant 0 : i32
    return %c0_i32, %c0_i32_0 : i32, i32
  }
  func.func @transform_3(%arg0: i32) -> (i32, i32) {
    %c0_i32 = arith.constant 0 : i32
    %c0_i32_0 = arith.constant 0 : i32
    %c0_i32_1 = arith.constant 0 : i32
    return %c0_i32, %c0_i32_0 : i32, i32
  }
  func.func @transform_4(%arg0: i32) -> (i32, i32) {
    %c0_i32 = arith.constant 0 : i32
    %c0_i32_0 = arith.constant 0 : i32
    %c0_i32_1 = arith.constant 0 : i32
    return %c0_i32, %c0_i32_0 : i32, i32
  }
  func.func @transform_5(%arg0: i32) -> (i32, i32) {
    %c0_i32 = arith.constant 0 : i32
    %c0_i32_0 = arith.constant 0 : i32
    return %arg0, %c0_i32 : i32, i32
  }
}

</mosaic_0001>

<bundles_post_ra>
// kernel: nn_ossr_forward.1
= control target key start
LH: loop header
LB: loop body
LE: loop exit
PB: predicated region body
PF: predicated region fallthrough
CT: control target
= control target key end

     0   :  { %v307_v1 = vmov 0.0   ;;  %vm308_vm0 = vmmov 0   ;;  %vm46_vm1 = vcmask 261120   ;;  %s382_s0 = inlined_call_operand.vmem [shape: bf16[8,32], index: 0, kind: input, shape index: {}]   ;;  %s383_s1 = inlined_call_operand.vmem [shape: bf16[32,128], index: 1, kind: input, shape index: {}]   ;;  %s384_s2 = inlined_call_operand.vmem [shape: f32[1,128], index: 2, kind: input, shape index: {}]   ;;  %s385_s3 = inlined_call_operand.vmem [shape: bf16[128,10], index: 3, kind: input, shape index: {}]   ;;  %s386_s4 = inlined_call_operand.vmem [shape: f32[1,10], index: 4, kind: input, shape index: {}]   ;;  %s387_s5 = inlined_call_operand.hbm [shape: f32[8,10], index: 5, kind: output, shape index: {}]  }
   0x1   :  { %v275_v0 = vld [vmem:[%s383_s1 + $0x8] sm:$0xff]   ;;  %244 = vmatprep.subr.bf16.mxu0 %v307_v1  ;;  %252 = vmatprep.subr.bf16.mxu1 %v307_v1  ;;  %v276_v2 = vld [vmem:[%s383_s1] sm:$0xff]   ;;  %v277_v3 = vld [vmem:[%s385_s3 + $0x38] sm:$0xff]  }
   0x2   :  { %245 = vmatpush3.bf16.msra.mxu0 %v275_v0  ;;  %248 = vmatprep.mubr.msk.bf16.mxu0 %vm308_vm0, %v307_v1  ;;  %v278_v4 = vld [vmem:[%s385_s3 + $0x30] sm:$0xff]   ;;  %v22_v5 = vld [vmem:[%s382_s0] sm:$0xf]  ;;  %v279_v6 = vld [vmem:[%s385_s3 + $0x28] sm:$0xff]  }
   0x3   :  { %246 = vmatprep.subr.bf16.mxu0 %v307_v1  ;;  %268 = vmatprep.mubr.msk.bf16.mxu1 %vm308_vm0, %v307_v1 }
   0x4   :  { %253 = vmatpush3.bf16.msra.mxu1 %v277_v3 }
   0x5   :  { %254 = vmatprep.subr.bf16.mxu1 %v307_v1 }
   0x6   :  { %247 = vmatpush3.bf16.msra.mxu0 %v276_v2 }
   0x8   :  { %255 = vmatpush3.bf16.msra.mxu1 %v278_v4 }
   0x9   :  { %249 = vmatmul.mubr.msk.bf16.vlgmr.msra.gmra.mxu0 %vm46_vm1, %v22_v5  ;;  %256 = vmatprep.subr.bf16.mxu1 %v307_v1 }
   0xa   :  { %10 = vsyncpa [#allocation3], 0  ;;  %v280_v7 = vld [vmem:[%s385_s3 + $0x20] sm:$0xff]   ;;  %v281_v8 = vld [vmem:[%s385_s3 + $0x18] sm:$0xff]   ;;  %s309_s17 = smov [#allocation2]   ;;  %vm203_vm2 = vcmask 80896  }
   0xb   :  { %v282_v9 = vld [vmem:[%s385_s3 + $0x10] sm:$0xff]   ;;  %v283_v10 = vld [vmem:[%s385_s3 + $0x8] sm:$0xff]   ;;  %v284_v11 = vld [vmem:[%s385_s3] sm:$0xff]   ;;  %s211_s18 = sshll.u32 %s309_s17, 4  ;;  %s212_s18 = int_to_ptr.vmem [resolvable:$true] %s211_s18 }
   0xc   :  { %257 = vmatpush3.bf16.msra.mxu1 %v279_v6  ;;  %v219_v12 = vld [vmem:[%s384_s2] ss:$0 sm:$0xff]  ;;  %s285_s2 = scalar_lea.vmem %s212_s18, 128  ;;  %p290_p1 = scmp.lt.s32.totalorder %s212_s18, %s212_s18 }
   0xd   :  { %258 = vmatprep.subr.bf16.mxu1 %v307_v1  ;;  %v223_v20 = vld [vmem:[%s386_s4] ss:$0 sm:$0xff]  ;;  %p286_p0 = scmp.ne.s32.totalorder %s212_s18, %s285_s2  ;;  %p291_p2 = scmp.lt.s32.totalorder %s285_s2, %s285_s2 }
   0xf   :  { %p292_p3 = por %p291_p2, %p290_p1 }
  0x10   :  { %259 = vmatpush3.bf16.msra.mxu1 %v280_v7 }
  0x11   :  { %260 = vmatprep.subr.bf16.mxu1 %v307_v1  ;;  %p293_p4 = pnand %p292_p3, %p286_p0 }
  0x14   :  { %261 = vmatpush3.bf16.msra.mxu1 %v281_v8 }
  0x15   :  { %262 = vmatprep.subr.bf16.mxu1 %v307_v1 }
  0x18   :  { %263 = vmatpush3.bf16.msra.mxu1 %v282_v9 }
  0x19   :  { %264 = vmatprep.subr.bf16.mxu1 %v307_v1 }
  0x1c   :  { %265 = vmatpush3.bf16.msra.mxu1 %v283_v10 }
  0x1d   :  { %266 = vmatprep.subr.bf16.mxu1 %v307_v1 }
  0x20   :  { %267 = vmatpush3.bf16.msra.mxu1 %v284_v11 }
  0xc9   :  { %v84_v13 = vpop.f32.mrf.mxu0 }
  0xca   :  { %v85_v14 = vadd.f32 %v219_v12, %v84_v13 }
  0xcb   :  { %v250_v15 = vpop.f32.mrf.mxu0 }
  0xcc   :  { %v90_v16 = vmax.f32 %v85_v14, 0.0 }
  0xcd   :  { %v87_v17 = vpop.f32.mrf.mxu0 }
  0xce   :  { %v91_v18 = vpack.c.bf16 %v90_v16, %v90_v16 }
  0xcf   :  { %v251_v19 = vpop.f32.mrf.mxu0 }
  0xd0   :  { %269 = vmatmul.mubr.bf16.vlgmr.msra.gmra.mxu1 %v91_v18 }
 0x190   :  { %v197_v21 = vpop.f32.mrf.mxu1 }
 0x191   :  { %v198_v22 = vadd.f32 %v223_v20, %v197_v21 }
 0x192   :  { %v270_v23 = vpop.f32.mrf.mxu1 }
 0x193   :  { %204 = vst.msk [vmem:[#allocation2] sm:$0xff] %vm203_vm2, %v198_v22 }
 0x194   :  { %v200_v24 = vpop.f32.mrf.mxu1 }
 0x195   :  { %296 = shalt.err (!%p293_p4)
}
 0x196   :  { %214 = dma.vmem_to_hbm [thread:$0]  %s212_s18, 128, %s387_s5, [#allocation3]   ;;  %v271_v25 = vpop.f32.mrf.mxu1 }
 0x197   :  { %305 = dma.done.wait [#allocation3], 128  }
 0x198   :  { %306 = vsyncadd [#allocation3], 4294967168 }
 0x199   :  { %218 = vsyncpa [#allocation3], 1 }

</bundles_post_ra>
